<compile_context>
chip_gen: v7x
topology: tpu7x:2x2x1
jax: 0.10.0
libtpu: 0.0.40
codegen_flags: <defaults>
</compile_context>

<pallas_src>
import functools

import jax
import jax.numpy as jnp
from jax.experimental import pallas as pl
from jax.experimental.pallas import tpu as pltpu

HIDDEN_DIM = 256
IMAGE_SIZE = 28 * 28           # 784
NUM_CLASSES = 10
IN_DIM = IMAGE_SIZE + NUM_CLASSES   # 794
LBL_PAD = 128                  # label-embedding contraction padded to one lane tile
OUT_PAD = 128                  # lane-dense output slab (real output is column 0)


def _leaky_relu(x, slope=0.2):
    return jnp.where(x > 0, x, slope * x)


def _round_up(n, m):
    return ((n + m - 1) // m) * m


def discriminator_kernel(x_ref, e_ref, w1i_ref, w1l_ref, b1_ref,
                         w2_ref, b2_ref, w3_ref, b3_ref, o_ref):
    # Layer 1: Linear(794 -> 256) expressed as x@W_img + emb@W_lbl (no concat).
    # bf16 operands, f32 accumulation, f32 epilogue.
    h = jnp.dot(x_ref[...], w1i_ref[...], preferred_element_type=jnp.float32)
    h = h + jnp.dot(e_ref[...], w1l_ref[...],
                    preferred_element_type=jnp.float32)
    h = _leaky_relu(h + b1_ref[...])

    # Layer 2: Linear(256 -> 256) + LeakyReLU(0.2)
    h = jnp.dot(h.astype(w2_ref.dtype), w2_ref[...],
                preferred_element_type=jnp.float32)
    h = _leaky_relu(h + b2_ref[...])

    # Layer 3: Linear(256 -> 1) + Sigmoid, padded to 128 output lanes.
    logit = jnp.dot(h.astype(w3_ref.dtype), w3_ref[...],
                    preferred_element_type=jnp.float32) + b3_ref[...]
    o_ref[...] = jax.nn.sigmoid(logit)


def discriminator_forward(x, labels, params, *, block_b=512,
                          compute_dtype=jnp.bfloat16):
    """x: [B, 784] float32, labels: [B] int32 -> [B, 1] float32."""
    B = x.shape[0]
    TB = min(block_b, _round_up(B, 8))
    B_pad = _round_up(B, TB)

    # ---- wrapper-side glue: gather + exact zero padding + dtype casts ----
    emb_pad = jnp.zeros((NUM_CLASSES, LBL_PAD), jnp.float32)
    emb_pad = emb_pad.at[:, :NUM_CLASSES].set(params["emb"])
    e = emb_pad[labels]                                        # [B, 128]

    w1 = params["w1"]
    w1_img = w1[:IMAGE_SIZE].astype(compute_dtype)             # [784, 256]
    w1_lbl = jnp.zeros((LBL_PAD, HIDDEN_DIM), jnp.float32)
    w1_lbl = w1_lbl.at[:NUM_CLASSES].set(w1[IMAGE_SIZE:]).astype(compute_dtype)
    w2 = params["w2"].astype(compute_dtype)
    w3_pad = jnp.zeros((HIDDEN_DIM, OUT_PAD), jnp.float32)
    w3_pad = w3_pad.at[:, :1].set(params["w3"]).astype(compute_dtype)
    b3_pad = jnp.zeros((1, OUT_PAD), jnp.float32).at[:, :1].set(params["b3"])

    x_p = jnp.pad(x, ((0, B_pad - B), (0, 0))).astype(compute_dtype)
    e_p = jnp.pad(e, ((0, B_pad - B), (0, 0))).astype(compute_dtype)

    const = lambda i: (0, 0)   # weights/biases stay VMEM-resident across the grid
    out = pl.pallas_call(
        discriminator_kernel,
        out_shape=jax.ShapeDtypeStruct((B_pad, OUT_PAD), jnp.float32),
        grid=(B_pad // TB,),
        in_specs=[
            pl.BlockSpec((TB, IMAGE_SIZE), lambda i: (i, 0)),   # x tile
            pl.BlockSpec((TB, LBL_PAD), lambda i: (i, 0)),      # label-emb tile
            pl.BlockSpec((IMAGE_SIZE, HIDDEN_DIM), const),      # w1_img
            pl.BlockSpec((LBL_PAD, HIDDEN_DIM), const),         # w1_lbl (padded)
            pl.BlockSpec((1, HIDDEN_DIM), const),               # b1
            pl.BlockSpec((HIDDEN_DIM, HIDDEN_DIM), const),      # w2
            pl.BlockSpec((1, HIDDEN_DIM), const),               # b2
            pl.BlockSpec((HIDDEN_DIM, OUT_PAD), const),         # w3 (padded)
            pl.BlockSpec((1, OUT_PAD), const),                  # b3 (padded)
        ],
        out_specs=pl.BlockSpec((TB, OUT_PAD), lambda i: (i, 0)),
        compiler_params=pltpu.CompilerParams(
            dimension_semantics=("parallel",)),
    )(x_p, e_p, w1_img, w1_lbl, params["b1"], w2, params["b2"],
      w3_pad, b3_pad)

    return out[:B, :1]


def init_params(key):
    """Deterministic init matching the PyTorch module's parameter shapes."""
    ks = jax.random.split(key, 7)

    def uniform(k, shape, fan_in):
        bound = 1.0 / jnp.sqrt(jnp.float32(fan_in))
        return jax.random.uniform(k, shape, jnp.float32, -bound, bound)

    return {
        # nn.Embedding(10, 10): standard normal init
        "emb": jax.random.normal(ks[0], (NUM_CLASSES, NUM_CLASSES),
                                 jnp.float32),
        # Linear(794, 256)  (stored transposed: [in, out])
        "w1": uniform(ks[1], (IN_DIM, HIDDEN_DIM), IN_DIM),
        "b1": uniform(ks[2], (1, HIDDEN_DIM), IN_DIM),
        # Linear(256, 256)
        "w2": uniform(ks[3], (HIDDEN_DIM, HIDDEN_DIM), HIDDEN_DIM),
        "b2": uniform(ks[4], (1, HIDDEN_DIM), HIDDEN_DIM),
        # Linear(256, 1)
        "w3": uniform(ks[5], (HIDDEN_DIM, 1), HIDDEN_DIM),
        "b3": uniform(ks[6], (1, 1), HIDDEN_DIM),
    }


def reference_forward(x, labels, params, compute_dtype=jnp.bfloat16):
    """Pure-JAX reference using the same bf16-operand / f32-accum math."""
    x_cat = jnp.concatenate([x, params["emb"][labels]], axis=1)

    def lin(a, w, b):
        return jnp.dot(a.astype(compute_dtype), w.astype(compute_dtype),
                       preferred_element_type=jnp.float32) + b

    h = _leaky_relu(lin(x_cat, params["w1"], params["b1"]))
    h = _leaky_relu(lin(h, params["w2"], params["b2"]))
    return jax.nn.sigmoid(lin(h, params["w3"], params["b3"]))


if __name__ == "__main__":
    key = jax.random.PRNGKey(0)
    k_param, k_x, k_lbl = jax.random.split(key, 3)

    B = 8
    params = init_params(k_param)
    x = jax.random.normal(k_x, (B, IMAGE_SIZE), jnp.float32)
    labels = jax.random.randint(k_lbl, (B,), 0, NUM_CLASSES, jnp.int32)

    fwd = jax.jit(functools.partial(discriminator_forward, params=params))
    out = jax.block_until_ready(fwd(x, labels))
    ref = jax.block_until_ready(reference_forward(x, labels, params))

    assert out.shape == (B, 1), out.shape
    assert jnp.allclose(out, ref, atol=2e-3, rtol=1e-3), \
        f"mismatch: max abs diff = {jnp.max(jnp.abs(out - ref))}"
    print("KERNEL_OK")
</pallas_src>

<mosaic_0001>
module attributes {stable_mosaic.version = 11 : i64} {
  func.func @discriminator_kernel(%arg0: i32, %arg1: memref<8x784xbf16, #tpu.memory_space<vmem>>, %arg2: memref<8x128xbf16, #tpu.memory_space<vmem>>, %arg3: memref<784x256xbf16, #tpu.memory_space<vmem>>, %arg4: memref<128x256xbf16, #tpu.memory_space<vmem>>, %arg5: memref<1x256xf32, #tpu.memory_space<vmem>>, %arg6: memref<256x256xbf16, #tpu.memory_space<vmem>>, %arg7: memref<1x256xf32, #tpu.memory_space<vmem>>, %arg8: memref<256x128xbf16, #tpu.memory_space<vmem>>, %arg9: memref<1x128xf32, #tpu.memory_space<vmem>>, %arg10: memref<8x128xf32, #tpu.memory_space<vmem>>) attributes {dimension_semantics = [#tpu.dimension_semantics<parallel>], iteration_bounds = array<i64: 1>, scalar_prefetch = 0 : i64, scratch_operands = 0 : i64, tpu.core_type = #tpu.core_type<tc>, window_params = [{transform_indices = @transform_0, window_bounds = array<i64: 8, 784>}, {transform_indices = @transform_1, window_bounds = array<i64: 8, 128>}, {pipeline_mode = #tpu.pipeline_mode<synchronous>, transform_indices = @transform_2, window_bounds = array<i64: 784, 256>}, {pipeline_mode = #tpu.pipeline_mode<synchronous>, transform_indices = @transform_3, window_bounds = array<i64: 128, 256>}, {pipeline_mode = #tpu.pipeline_mode<synchronous>, transform_indices = @transform_4, window_bounds = array<i64: 1, 256>}, {pipeline_mode = #tpu.pipeline_mode<synchronous>, transform_indices = @transform_5, window_bounds = array<i64: 256, 256>}, {pipeline_mode = #tpu.pipeline_mode<synchronous>, transform_indices = @transform_6, window_bounds = array<i64: 1, 256>}, {pipeline_mode = #tpu.pipeline_mode<synchronous>, transform_indices = @transform_7, window_bounds = array<i64: 256, 128>}, {pipeline_mode = #tpu.pipeline_mode<synchronous>, transform_indices = @transform_8, window_bounds = array<i64: 1, 128>}, {transform_indices = @transform_9, window_bounds = array<i64: 8, 128>}]} {
    %c0 = arith.constant 0 : index
    %c0_0 = arith.constant 0 : index
    %0 = vector.load %arg1[%c0, %c0_0] : memref<8x784xbf16, #tpu.memory_space<vmem>>, vector<8x784xbf16>
    %c0_1 = arith.constant 0 : index
    %c0_2 = arith.constant 0 : index
    %1 = vector.load %arg3[%c0_1, %c0_2] : memref<784x256xbf16, #tpu.memory_space<vmem>>, vector<784x256xbf16>
    %cst = arith.constant dense<0.000000e+00> : vector<8x256xf32>
    %2 = tpu.matmul %0, %1, %cst {dimension_numbers = #tpu.dot_dimension_numbers<[1], [0], [0], [1], [0, 0, 1, 1], [], []>} : vector<8x784xbf16>, vector<784x256xbf16>, vector<8x256xf32> -> vector<8x256xf32>
    %c0_3 = arith.constant 0 : index
    %c0_4 = arith.constant 0 : index
    %3 = vector.load %arg2[%c0_3, %c0_4] : memref<8x128xbf16, #tpu.memory_space<vmem>>, vector<8x128xbf16>
    %c0_5 = arith.constant 0 : index
    %c0_6 = arith.constant 0 : index
    %4 = vector.load %arg4[%c0_5, %c0_6] : memref<128x256xbf16, #tpu.memory_space<vmem>>, vector<128x256xbf16>
    %cst_7 = arith.constant dense<0.000000e+00> : vector<8x256xf32>
    %5 = tpu.matmul %3, %4, %cst_7 {dimension_numbers = #tpu.dot_dimension_numbers<[1], [0], [0], [1], [0, 0, 1, 1], [], []>} : vector<8x128xbf16>, vector<128x256xbf16>, vector<8x256xf32> -> vector<8x256xf32>
    %6 = arith.addf %2, %5 : vector<8x256xf32>
    %c0_8 = arith.constant 0 : index
    %c0_9 = arith.constant 0 : index
    %7 = vector.load %arg5[%c0_8, %c0_9] : memref<1x256xf32, #tpu.memory_space<vmem>>, vector<1x256xf32>
    %8 = vector.broadcast %7 : vector<1x256xf32> to vector<8x256xf32>
    %9 = arith.addf %6, %8 : vector<8x256xf32>
    %cst_10 = arith.constant 0.000000e+00 : f32
    %10 = vector.broadcast %cst_10 : f32 to vector<8x256xf32>
    %11 = arith.cmpf ogt, %9, %10 : vector<8x256xf32>
    %cst_11 = arith.constant 2.000000e-01 : f32
    %12 = vector.broadcast %cst_11 : f32 to vector<8x256xf32>
    %13 = arith.mulf %12, %9 : vector<8x256xf32>
    %14 = arith.select %11, %9, %13 : vector<8x256xi1>, vector<8x256xf32>
    %15 = arith.truncf %14 : vector<8x256xf32> to vector<8x256xbf16>
    %c0_12 = arith.constant 0 : index
    %c0_13 = arith.constant 0 : index
    %16 = vector.load %arg6[%c0_12, %c0_13] : memref<256x256xbf16, #tpu.memory_space<vmem>>, vector<256x256xbf16>
    %cst_14 = arith.constant dense<0.000000e+00> : vector<8x256xf32>
    %17 = tpu.matmul %15, %16, %cst_14 {dimension_numbers = #tpu.dot_dimension_numbers<[1], [0], [0], [1], [0, 0, 1, 1], [], []>} : vector<8x256xbf16>, vector<256x256xbf16>, vector<8x256xf32> -> vector<8x256xf32>
    %c0_15 = arith.constant 0 : index
    %c0_16 = arith.constant 0 : index
    %18 = vector.load %arg7[%c0_15, %c0_16] : memref<1x256xf32, #tpu.memory_space<vmem>>, vector<1x256xf32>
    %19 = vector.broadcast %18 : vector<1x256xf32> to vector<8x256xf32>
    %20 = arith.addf %17, %19 : vector<8x256xf32>
    %cst_17 = arith.constant 0.000000e+00 : f32
    %21 = vector.broadcast %cst_17 : f32 to vector<8x256xf32>
    %22 = arith.cmpf ogt, %20, %21 : vector<8x256xf32>
    %cst_18 = arith.constant 2.000000e-01 : f32
    %23 = vector.broadcast %cst_18 : f32 to vector<8x256xf32>
    %24 = arith.mulf %23, %20 : vector<8x256xf32>
    %25 = arith.select %22, %20, %24 : vector<8x256xi1>, vector<8x256xf32>
    %26 = arith.truncf %25 : vector<8x256xf32> to vector<8x256xbf16>
    %c0_19 = arith.constant 0 : index
    %c0_20 = arith.constant 0 : index
    %27 = vector.load %arg8[%c0_19, %c0_20] : memref<256x128xbf16, #tpu.memory_space<vmem>>, vector<256x128xbf16>
    %cst_21 = arith.constant dense<0.000000e+00> : vector<8x128xf32>
    %28 = tpu.matmul %26, %27, %cst_21 {dimension_numbers = #tpu.dot_dimension_numbers<[1], [0], [0], [1], [0, 0, 1, 1], [], []>} : vector<8x256xbf16>, vector<256x128xbf16>, vector<8x128xf32> -> vector<8x128xf32>
    %c0_22 = arith.constant 0 : index
    %c0_23 = arith.constant 0 : index
    %29 = vector.load %arg9[%c0_22, %c0_23] : memref<1x128xf32, #tpu.memory_space<vmem>>, vector<1x128xf32>
    %30 = vector.broadcast %29 : vector<1x128xf32> to vector<8x128xf32>
    %31 = arith.addf %28, %30 : vector<8x128xf32>
    %32 = arith.negf %31 : vector<8x128xf32>
    %33 = math.exp %32 : vector<8x128xf32>
    %cst_24 = arith.constant 1.000000e+00 : f32
    %34 = vector.broadcast %cst_24 : f32 to vector<8x128xf32>
    %35 = arith.addf %34, %33 : vector<8x128xf32>
    %36 = arith.divf %34, %35 : vector<8x128xf32>
    %c0_25 = arith.constant 0 : index
    %c0_26 = arith.constant 0 : index
    %37 = vector.load %arg10[%c0_25, %c0_26] : memref<8x128xf32, #tpu.memory_space<vmem>>, vector<8x128xf32>
    tpu.vector_store %arg10[%c0_25, %c0_26], %36 {strides = array<i32>} : memref<8x128xf32, #tpu.memory_space<vmem>>, vector<8x128xf32>,
    return
  }
  func.func @transform_0(%arg0: i32) -> (i32, i32) {
    %c0_i32 = arith.constant 0 : i32
    %c0_i32_0 = arith.constant 0 : i32
    return %arg0, %c0_i32 : i32, i32
  }
  func.func @transform_1(%arg0: i32) -> (i32, i32) {
    %c0_i32 = arith.constant 0 : i32
    %c0_i32_0 = arith.constant 0 : i32
    return %arg0, %c0_i32 : i32, i32
  }
  func.func @transform_2(%arg0: i32) -> (i32, i32) {
    %c0_i32 = arith.constant 0 : i32
    %c0_i32_0 = arith.constant 0 : i32
    %c0_i32_1 = arith.constant 0 : i32
    return %c0_i32, %c0_i32_0 : i32, i32
  }
  func.func @transform_3(%arg0: i32) -> (i32, i32) {
    %c0_i32 = arith.constant 0 : i32
    %c0_i32_0 = arith.constant 0 : i32
    %c0_i32_1 = arith.constant 0 : i32
    return %c0_i32, %c0_i32_0 : i32, i32
  }
  func.func @transform_4(%arg0: i32) -> (i32, i32) {
    %c0_i32 = arith.constant 0 : i32
    %c0_i32_0 = arith.constant 0 : i32
    %c0_i32_1 = arith.constant 0 : i32
    return %c0_i32, %c0_i32_0 : i32, i32
  }
  func.func @transform_5(%arg0: i32) -> (i32, i32) {
    %c0_i32 = arith.constant 0 : i32
    %c0_i32_0 = arith.constant 0 : i32
    %c0_i32_1 = arith.constant 0 : i32
    return %c0_i32, %c0_i32_0 : i32, i32
  }
  func.func @transform_6(%arg0: i32) -> (i32, i32) {
    %c0_i32 = arith.constant 0 : i32
    %c0_i32_0 = arith.constant 0 : i32
    %c0_i32_1 = arith.constant 0 : i32
    return %c0_i32, %c0_i32_0 : i32, i32
  }
  func.func @transform_7(%arg0: i32) -> (i32, i32) {
    %c0_i32 = arith.constant 0 : i32
    %c0_i32_0 = arith.constant 0 : i32
    %c0_i32_1 = arith.constant 0 : i32
    return %c0_i32, %c0_i32_0 : i32, i32
  }
  func.func @transform_8(%arg0: i32) -> (i32, i32) {
    %c0_i32 = arith.constant 0 : i32
    %c0_i32_0 = arith.constant 0 : i32
    %c0_i32_1 = arith.constant 0 : i32
    return %c0_i32, %c0_i32_0 : i32, i32
  }
  func.func @transform_9(%arg0: i32) -> (i32, i32) {
    %c0_i32 = arith.constant 0 : i32
    %c0_i32_0 = arith.constant 0 : i32
    return %arg0, %c0_i32 : i32, i32
  }
}

</mosaic_0001>

<bundles_post_ra>
// kernel: discriminator_forward.1
= control target key start
LH: loop header
LB: loop body
LE: loop exit
PB: predicated region body
PF: predicated region fallthrough
CT: control target
= control target key end

     0   :  { %v1857_v1 = vmov 0   ;;  %vm787_vm0 = vcmask 130048   ;;  %s2435_s3 = inlined_call_operand.vmem [shape: bf16[128,256], index: 3, kind: input, shape index: {}]   ;;  %s2436_s2 = inlined_call_operand.vmem [shape: bf16[784,256], index: 2, kind: input, shape index: {}]   ;;  %s2437_s1 = inlined_call_operand.vmem [shape: bf16[8,128], index: 1, kind: input, shape index: {}]   ;;  %s2438_s0 = inlined_call_operand.vmem [shape: bf16[8,784], index: 0, kind: input, shape index: {}]   ;;  %s2439_s5 = inlined_call_operand.vmem [shape: bf16[256,256], index: 5, kind: input, shape index: {}]   ;;  %s2440_s7 = inlined_call_operand.vmem [shape: bf16[256,128], index: 7, kind: input, shape index: {}]   ;;  %s2441_s4 = inlined_call_operand.vmem [shape: f32[1,256], index: 4, kind: input, shape index: {}]   ;;  %s2442_s6 = inlined_call_operand.vmem [shape: f32[1,256], index: 6, kind: input, shape index: {}]   ;;  %s2443_s8 = inlined_call_operand.vmem [shape: f32[1,128], index: 8, kind: input, shape index: {}]   ;;  %s2444_s9 = inlined_call_operand.vmem [shape: f32[8,128], index: 9, kind: output, shape index: {}]  }
   0x1   :  { %v1611_v0 = vld [vmem:[%s2435_s3 + $0x4] ss:$8 sps:$4 sm:$0xff]   ;;  %264 = vmatprep.mubr.bf16.mxu0 %v1857_v1  ;;  %v1615_v3 = vld [vmem:[%s2435_s3] ss:$8 sps:$4 sm:$0xff]   ;;  %v1617_v5 = vld [vmem:[%s2435_s3 + $0x14] ss:$8 sps:$4 sm:$0xff]  }
   0x2   :  { %v1613_v2 = vld [vmem:[%s2436_s2 + $0x4] ss:$8 sps:$4 sm:$0xff]   ;;  %232 = vmatprep.subr.bf16.mxu0 %v1611_v0  ;;  %v1616_v4 = vld [vmem:[%s2436_s2] ss:$8 sps:$4 sm:$0xff]   ;;  %v1619_v6 = vld [vmem:[%s2436_s2 + $0x14] ss:$8 sps:$4 sm:$0xff]  }
   0x3   :  { %791 = vmatprep.subr.bf16.mxu1 %v1613_v2  ;;  %233 = vmatpush1.bf16.msra.mxu0 %v1615_v3  ;;  %v1621_v7 = vld [vmem:[%s2435_s3 + $0x10] ss:$8 sps:$4 sm:$0xff]   ;;  %v1623_v9 = vld [vmem:[%s2435_s3 + $0x24] ss:$8 sps:$4 sm:$0xff]   ;;  %v1627_v11 = vld [vmem:[%s2435_s3 + $0x20] ss:$8 sps:$4 sm:$0xff]  }
   0x4   :  { %792 = vmatpush1.bf16.msra.mxu1 %v1616_v4  ;;  %234 = vmatprep.subr.bf16.mxu0 %v1617_v5  ;;  %v1622_v8 = vld [vmem:[%s2436_s2 + $0x10] ss:$8 sps:$4 sm:$0xff]   ;;  %v1625_v10 = vld [vmem:[%s2436_s2 + $0x24] ss:$8 sps:$4 sm:$0xff]   ;;  %v1628_v12 = vld [vmem:[%s2436_s2 + $0x20] ss:$8 sps:$4 sm:$0xff]  }
   0x5   :  { %793 = vmatprep.subr.bf16.mxu1 %v1619_v6  ;;  %v1629_v13 = vld [vmem:[%s2435_s3 + $0x34] ss:$8 sps:$4 sm:$0xff]   ;;  %v1633_v15 = vld [vmem:[%s2435_s3 + $0x30] ss:$8 sps:$4 sm:$0xff]   ;;  %v1635_v17 = vld [vmem:[%s2435_s3 + $0x44] ss:$8 sps:$4 sm:$0xff]  }
   0x6   :  { %v1631_v14 = vld [vmem:[%s2436_s2 + $0x34] ss:$8 sps:$4 sm:$0xff]   ;;  %v1634_v16 = vld [vmem:[%s2436_s2 + $0x30] ss:$8 sps:$4 sm:$0xff]   ;;  %v1637_v18 = vld [vmem:[%s2436_s2 + $0x44] ss:$8 sps:$4 sm:$0xff]  }
   0x7   :  { %235 = vmatpush1.bf16.msra.mxu0 %v1621_v7  ;;  %v1639_v19 = vld [vmem:[%s2435_s3 + $0x40] ss:$8 sps:$4 sm:$0xff]   ;;  %v1641_v21 = vld [vmem:[%s2435_s3 + $0x54] ss:$8 sps:$4 sm:$0xff]   ;;  %v1645_v23 = vld [vmem:[%s2435_s3 + $0x50] ss:$8 sps:$4 sm:$0xff]  }
   0x8   :  { %794 = vmatpush1.bf16.msra.mxu1 %v1622_v8  ;;  %236 = vmatprep.subr.bf16.mxu0 %v1623_v9  ;;  %v1640_v20 = vld [vmem:[%s2436_s2 + $0x40] ss:$8 sps:$4 sm:$0xff]   ;;  %v1643_v22 = vld [vmem:[%s2436_s2 + $0x54] ss:$8 sps:$4 sm:$0xff]   ;;  %v1646_v24 = vld [vmem:[%s2436_s2 + $0x50] ss:$8 sps:$4 sm:$0xff]  }
   0x9   :  { %795 = vmatprep.subr.bf16.mxu1 %v1625_v10  ;;  %v1647_v25 = vld [vmem:[%s2435_s3 + $0x64] ss:$8 sps:$4 sm:$0xff]   ;;  %v1651_v27 = vld [vmem:[%s2435_s3 + $0x60] ss:$8 sps:$4 sm:$0xff]   ;;  %v1653_v29 = vld [vmem:[%s2435_s3 + $0x74] ss:$8 sps:$4 sm:$0xff]  }
   0xa   :  { %v1649_v26 = vld [vmem:[%s2436_s2 + $0x64] ss:$8 sps:$4 sm:$0xff]   ;;  %v1652_v28 = vld [vmem:[%s2436_s2 + $0x60] ss:$8 sps:$4 sm:$0xff]   ;;  %v1655_v30 = vld [vmem:[%s2436_s2 + $0x74] ss:$8 sps:$4 sm:$0xff]  }
   0xb   :  { %237 = vmatpush1.bf16.msra.mxu0 %v1627_v11  ;;  %v1657_v31 = vld [vmem:[%s2435_s3 + $0x70] ss:$8 sps:$4 sm:$0xff]   ;;  %v1659_v33 = vld [vmem:[%s2436_s2 + $0x84] ss:$8 sps:$4 sm:$0xff]   ;;  %v1661_v35 = vld [vmem:[%s2436_s2 + $0x100] ss:$8 sps:$4 sm:$0xff]  }
   0xc   :  { %796 = vmatpush1.bf16.msra.mxu1 %v1628_v12  ;;  %238 = vmatprep.subr.bf16.mxu0 %v1629_v13  ;;  %v1658_v32 = vld [vmem:[%s2436_s2 + $0x70] ss:$8 sps:$4 sm:$0xff]   ;;  %v1663_v34 = vld [vmem:[%s2436_s2 + $0x104] ss:$8 sps:$4 sm:$0xff]   ;;  %v135_v36 = vld [vmem:[%s2437_s1] sm:$0xf] }
   0xd   :  { %797 = vmatprep.subr.bf16.mxu1 %v1631_v14  ;;  %v1664_v37 = vld [vmem:[%s2436_s2 + $0x80] ss:$8 sps:$4 sm:$0xff]   ;;  %v1665_v38 = vld [vmem:[%s2436_s2 + $0x94] ss:$8 sps:$4 sm:$0xff]   ;;  %v1667_v40 = vld [vmem:[%s2436_s2 + $0x110] ss:$8 sps:$4 sm:$0xff]  }
   0xe   :  { %v1669_v39 = vld [vmem:[%s2436_s2 + $0x114] ss:$8 sps:$4 sm:$0xff]   ;;  %v1670_v41 = vld [vmem:[%s2436_s2 + $0x90] ss:$8 sps:$4 sm:$0xff]   ;;  %v1671_v42 = vld [vmem:[%s2436_s2 + $0xa4] ss:$8 sps:$4 sm:$0xff]  }
   0xf   :  { %239 = vmatpush1.bf16.msra.mxu0 %v1633_v15  ;;  %v1675_v43 = vld [vmem:[%s2436_s2 + $0x124] ss:$8 sps:$4 sm:$0xff]   ;;  %v1673_v44 = vld [vmem:[%s2436_s2 + $0x120] ss:$8 sps:$4 sm:$0xff]   ;;  %v1677_v46 = vld [vmem:[%s2436_s2 + $0xb4] ss:$8 sps:$4 sm:$0xff]  }
  0x10   :  { %798 = vmatpush1.bf16.msra.mxu1 %v1634_v16  ;;  %240 = vmatprep.subr.bf16.mxu0 %v1635_v17  ;;  %v1676_v45 = vld [vmem:[%s2436_s2 + $0xa0] ss:$8 sps:$4 sm:$0xff]   ;;  %v1681_v47 = vld [vmem:[%s2436_s2 + $0x134] ss:$8 sps:$4 sm:$0xff]   ;;  %v1679_v48 = vld [vmem:[%s2436_s2 + $0x130] ss:$8 sps:$4 sm:$0xff]  }
  0x11   :  { %799 = vmatprep.subr.bf16.mxu1 %v1637_v18  ;;  %v1682_v49 = vld [vmem:[%s2436_s2 + $0xb0] ss:$8 sps:$4 sm:$0xff]   ;;  %v33_v50 = vld [vmem:[%s2438_s0] sm:$0xff]  ;;  %v1689_v56 = vld [vmem:[%s2436_s2 + $0xd4] ss:$8 sps:$4 sm:$0xff]  }
  0x12   :  { %v1683_v51 = vld [vmem:[%s2436_s2 + $0xc4] ss:$8 sps:$4 sm:$0xff]   ;;  %v1433_v52 = vcombine.high %v33_v50, %v33_v50  ;;  %v1685_v54 = vld [vmem:[%s2436_s2 + $0x140] ss:$8 sps:$4 sm:$0xff]   ;;  %v1693_v57 = vld [vmem:[%s2436_s2 + $0x154] ss:$8 sps:$4 sm:$0xff]   ;;  %v1432_v7 = vcombine.low %v33_v50, %v33_v50 }
  0x13   :  { %241 = vmatpush1.bf16.msra.mxu0 %v1639_v19  ;;  %v1687_v53 = vld [vmem:[%s2436_s2 + $0x144] ss:$8 sps:$4 sm:$0xff]   ;;  %v1688_v55 = vld [vmem:[%s2436_s2 + $0xc0] ss:$8 sps:$4 sm:$0xff]   ;;  %v1691_v58 = vld [vmem:[%s2436_s2 + $0x150] ss:$8 sps:$4 sm:$0xff]  }
  0x14   :  { %800 = vmatpush1.bf16.msra.mxu1 %v1640_v20  ;;  %242 = vmatprep.subr.bf16.mxu0 %v1641_v21  ;;  %v1694_v59 = vld [vmem:[%s2436_s2 + $0xd0] ss:$8 sps:$4 sm:$0xff]   ;;  %v1695_v60 = vld [vmem:[%s2436_s2 + $0xe4] ss:$8 sps:$4 sm:$0xff]   ;;  %v1697_v62 = vld [vmem:[%s2436_s2 + $0x160] ss:$8 sps:$4 sm:$0xff]  }
  0x15   :  { %801 = vmatprep.subr.bf16.mxu1 %v1643_v22  ;;  %823 = vmatprep.mubr.bf16.mxu1 %v1433_v52  ;;  %v1699_v61 = vld [vmem:[%s2436_s2 + $0x164] ss:$8 sps:$4 sm:$0xff]   ;;  %v1700_v63 = vld [vmem:[%s2436_s2 + $0xe0] ss:$8 sps:$4 sm:$0xff]   ;;  %v1701_v0 = vld [vmem:[%s2436_s2 + $0xf4] ss:$8 sps:$4 sm:$0xff]  }
  0x16   :  { %v1705_v2 = vld [vmem:[%s2436_s2 + $0x174] ss:$8 sps:$4 sm:$0xff]   ;;  %v1703_v3 = vld [vmem:[%s2436_s2 + $0x170] ss:$8 sps:$4 sm:$0xff]   ;;  %v1712_v5 = vld [vmem:[%s2436_s2 + $0x184] ss:$8 sps:$4 sm:$0xff]  }
  0x17   :  { %243 = vmatpush1.bf16.msra.mxu0 %v1645_v23  ;;  %v1706_v4 = vld [vmem:[%s2436_s2 + $0xf0] ss:$8 sps:$4 sm:$0xff]   ;;  %v1715_v6 = vld [vmem:[%s2436_s2 + $0x204] ss:$8 sps:$4 sm:$0xff]   ;;  %v1710_v8 = vld [vmem:[%s2436_s2 + $0x180] ss:$8 sps:$4 sm:$0xff]  }
  0x18   :  { %802 = vmatpush1.bf16.msra.mxu1 %v1646_v24  ;;  %244 = vmatprep.subr.bf16.mxu0 %v1647_v25  ;;  %v1713_v9 = vld [vmem:[%s2436_s2 + $0x200] ss:$8 sps:$4 sm:$0xff]   ;;  %v1718_v10 = vld [vmem:[%s2436_s2 + $0x194] ss:$8 sps:$4 sm:$0xff]   ;;  %v1716_v14 = vld [vmem:[%s2436_s2 + $0x190] ss:$8 sps:$4 sm:$0xff]  }
  0x19   :  { %803 = vmatprep.subr.bf16.mxu1 %v1649_v26  ;;  %v1721_v11 = vld [vmem:[%s2436_s2 + $0x214] ss:$8 sps:$4 sm:$0xff]   ;;  %v2128_v12 = vld [vmem:[%s2438_s0 + $0x8] sm:$0xff]  ;;  %v1719_v15 = vld [vmem:[%s2436_s2 + $0x210] ss:$8 sps:$4 sm:$0xff]  }
  0x1a   :  { %v1435_v13 = vcombine.high %v2128_v12, %v2128_v12  ;;  %v1724_v16 = vld [vmem:[%s2436_s2 + $0x1a4] ss:$8 sps:$4 sm:$0xff]   ;;  %v1722_v18 = vld [vmem:[%s2436_s2 + $0x1a0] ss:$8 sps:$4 sm:$0xff]   ;;  %v1730_v20 = vld [vmem:[%s2436_s2 + $0x1b4] ss:$8 sps:$4 sm:$0xff]  }
  0x1b   :  { %245 = vmatpush1.bf16.msra.mxu0 %v1651_v27  ;;  %v1727_v17 = vld [vmem:[%s2436_s2 + $0x224] ss:$8 sps:$4 sm:$0xff]   ;;  %v1725_v19 = vld [vmem:[%s2436_s2 + $0x220] ss:$8 sps:$4 sm:$0xff]   ;;  %v1733_v21 = vld [vmem:[%s2436_s2 + $0x234] ss:$8 sps:$4 sm:$0xff]  }
  0x1c   :  { %804 = vmatpush1.bf16.msra.mxu1 %v1652_v28  ;;  %246 = vmatprep.subr.bf16.mxu0 %v1653_v29  ;;  %v1728_v22 = vld [vmem:[%s2436_s2 + $0x1b0] ss:$8 sps:$4 sm:$0xff]   ;;  %v1736_v24 = vld [vmem:[%s2436_s2 + $0x1c4] ss:$8 sps:$4 sm:$0xff]   ;;  %v1734_v28 = vld [vmem:[%s2436_s2 + $0x1c0] ss:$8 sps:$4 sm:$0xff]  }
  0x1d   :  { %805 = vmatprep.subr.bf16.mxu1 %v1655_v30  ;;  %v1731_v23 = vld [vmem:[%s2436_s2 + $0x230] ss:$8 sps:$4 sm:$0xff]   ;;  %v1739_v25 = vld [vmem:[%s2436_s2 + $0x244] ss:$8 sps:$4 sm:$0xff]   ;;  %v1737_v29 = vld [vmem:[%s2436_s2 + $0x240] ss:$8 sps:$4 sm:$0xff]  }
  0x1e   :  { %v2171_v26 = vld [vmem:[%s2438_s0 + $0x10] sm:$0xff]  ;;  %v1709_v50 = vld [vmem:[%s2438_s0 + $0x18] ss:$0 sps:$4 sm:$0xff]  }
  0x1f   :  { %247 = vmatpush1.bf16.msra.mxu0 %v1657_v31  ;;  %v1437_v27 = vcombine.high %v2171_v26, %v2171_v26  ;;  %v1742_v30 = vld [vmem:[%s2436_s2 + $0x1d4] ss:$8 sps:$4 sm:$0xff]  }
  0x20   :  { %806 = vmatpush1.bf16.msra.mxu1 %v1658_v32  ;;  %832 = vmatprep.subr.bf16.mxu0 %v1663_v34  ;;  %v1745_v31 = vld [vmem:[%s2436_s2 + $0x254] ss:$8 sps:$4 sm:$0xff]   ;;  %v1740_v32 = vld [vmem:[%s2436_s2 + $0x1d0] ss:$8 sps:$4 sm:$0xff]   ;;  %v1748_v34 = vld [vmem:[%s2436_s2 + $0x1e4] ss:$8 sps:$4 sm:$0xff]  }
  0x21   :  { %807 = vmatprep.subr.bf16.mxu1 %v1659_v33  ;;  %v1743_v33 = vld [vmem:[%s2436_s2 + $0x250] ss:$8 sps:$4 sm:$0xff]   ;;  %v1771_v52 = vld [vmem:[%s2436_s2 + $0x2b4] ss:$8 sps:$4 sm:$0xff]  }
  0x22   :  { %265 = vmatmul.mubr.bf16.vlgmr.msra.gmra.mrb[0].mxu0 %v135_v36  ;;  %v1746_v36 = vld [vmem:[%s2436_s2 + $0x1e0] ss:$8 sps:$4 sm:$0xff]  }
  0x23   :  { %833 = vmatpush1.bf16.msra.mxu0 %v1661_v35  ;;  %864 = vmatprep.mubr.bf16.mxu0 %v1435_v13  ;;  %v1751_v35 = vld [vmem:[%s2436_s2 + $0x264] ss:$8 sps:$4 sm:$0xff]   ;;  %v1812_v13 = vld [vmem:[%s2439_s5 + $0x74] ss:$8 sps:$4 sm:$0xff]  }
  0x24   :  { %808 = vmatpush1.bf16.msra.mxu1 %v1664_v37  ;;  %834 = vmatprep.subr.bf16.mxu0 %v1669_v39  ;;  %v1749_v37 = vld [vmem:[%s2436_s2 + $0x260] ss:$8 sps:$4 sm:$0xff]   ;;  %v1757_v39 = vld [vmem:[%s2436_s2 + $0x274] ss:$8 sps:$4 sm:$0xff]  }
  0x25   :  { %809 = vmatprep.subr.bf16.mxu1 %v1665_v38  ;;  %v1754_v38 = vld [vmem:[%s2436_s2 + $0x1f4] ss:$8 sps:$4 sm:$0xff]  }
  0x27   :  { %835 = vmatpush1.bf16.msra.mxu0 %v1667_v40  ;;  %v1752_v40 = vld [vmem:[%s2436_s2 + $0x1f0] ss:$8 sps:$4 sm:$0xff]  }
  0x28   :  { %810 = vmatpush1.bf16.msra.mxu1 %v1670_v41  ;;  %836 = vmatprep.subr.bf16.mxu0 %v1675_v43  ;;  %v1755_v41 = vld [vmem:[%s2436_s2 + $0x270] ss:$8 sps:$4 sm:$0xff]   ;;  %v1783_v43 = vld [vmem:[%s2436_s2 + $0x304] ss:$8 sps:$4 sm:$0xff]  }
  0x29   :  { %811 = vmatprep.subr.bf16.mxu1 %v1671_v42  ;;  %v1762_v42 = vld [vmem:[%s2436_s2 + $0x284] ss:$8 sps:$4 sm:$0xff]  }
  0x2b   :  { %837 = vmatpush1.bf16.msra.mxu0 %v1673_v44  ;;  %v1434_v44 = vcombine.low %v2128_v12, %v2128_v12  ;;  %v1807_v12 = vld [vmem:[%s2439_s5 + $0x60] ss:$8 sps:$4 sm:$0xff]  }
  0x2c   :  { %812 = vmatpush1.bf16.msra.mxu1 %v1676_v45  ;;  %838 = vmatprep.subr.bf16.mxu0 %v1681_v47  ;;  %v1760_v45 = vld [vmem:[%s2436_s2 + $0x280] ss:$8 sps:$4 sm:$0xff]   ;;  %v1765_v47 = vld [vmem:[%s2436_s2 + $0x294] ss:$8 sps:$4 sm:$0xff]  }
  0x2d   :  { %813 = vmatprep.subr.bf16.mxu1 %v1677_v46  ;;  %v1781_v46 = vld [vmem:[%s2436_s2 + $0x300] ss:$8 sps:$4 sm:$0xff]  }
  0x2f   :  { %839 = vmatpush1.bf16.msra.mxu0 %v1679_v48  ;;  %v1763_v48 = vld [vmem:[%s2436_s2 + $0x290] ss:$8 sps:$4 sm:$0xff]  }
  0x30   :  { %814 = vmatpush1.bf16.msra.mxu1 %v1682_v49  ;;  %840 = vmatprep.subr.bf16.mxu0 %v1687_v53  ;;  %v1768_v49 = vld [vmem:[%s2436_s2 + $0x2a4] ss:$8 sps:$4 sm:$0xff]  }
  0x31   :  { %815 = vmatprep.subr.bf16.mxu1 %v1683_v51  ;;  %v1766_v51 = vld [vmem:[%s2436_s2 + $0x2a0] ss:$8 sps:$4 sm:$0xff]   ;;  %v1774_v53 = vld [vmem:[%s2436_s2 + $0x2c4] ss:$8 sps:$4 sm:$0xff]  }
  0x33   :  { %841 = vmatpush1.bf16.msra.mxu0 %v1685_v54  ;;  %v1772_v54 = vld [vmem:[%s2436_s2 + $0x2c0] ss:$8 sps:$4 sm:$0xff]  }
  0x34   :  { %816 = vmatpush1.bf16.msra.mxu1 %v1688_v55  ;;  %842 = vmatprep.subr.bf16.mxu0 %v1693_v57  ;;  %v1777_v55 = vld [vmem:[%s2436_s2 + $0x2d4] ss:$8 sps:$4 sm:$0xff]   ;;  %v1780_v57 = vld [vmem:[%s2436_s2 + $0x2e4] ss:$8 sps:$4 sm:$0xff]  }
  0x35   :  { %817 = vmatprep.subr.bf16.mxu1 %v1689_v56  ;;  %v1775_v56 = vld [vmem:[%s2436_s2 + $0x2d0] ss:$8 sps:$4 sm:$0xff]  }
  0x37   :  { %843 = vmatpush1.bf16.msra.mxu0 %v1691_v58  ;;  %v1778_v58 = vld [vmem:[%s2436_s2 + $0x2e0] ss:$8 sps:$4 sm:$0xff]  }
  0x38   :  { %818 = vmatpush1.bf16.msra.mxu1 %v1694_v59  ;;  %844 = vmatprep.subr.bf16.mxu0 %v1699_v61  ;;  %v1786_v59 = vld [vmem:[%s2436_s2 + $0x2f4] ss:$8 sps:$4 sm:$0xff]   ;;  %v1436_v61 = vcombine.low %v2171_v26, %v2171_v26  ;;  %v1828_v26 = vld [vmem:[%s2439_s5 + $0xd0] ss:$8 sps:$4 sm:$0xff]  }
  0x39   :  { %819 = vmatprep.subr.bf16.mxu1 %v1695_v60  ;;  %v1784_v60 = vld [vmem:[%s2436_s2 + $0x2f0] ss:$8 sps:$4 sm:$0xff]  }
  0x3b   :  { %845 = vmatpush1.bf16.msra.mxu0 %v1697_v62  ;;  %v1789_v62 = vld [vmem:[%s2439_s5] ss:$8 sps:$4 sm:$0xff]  }
  0x3c   :  { %820 = vmatpush1.bf16.msra.mxu1 %v1700_v63  ;;  %846 = vmatprep.subr.bf16.mxu0 %v1705_v2  ;;  %v1791_v63 = vld [vmem:[%s2439_s5 + $0x4] ss:$8 sps:$4 sm:$0xff]   ;;  %v1792_v2 = vld [vmem:[%s2439_s5 + $0x10] ss:$8 sps:$4 sm:$0xff]  }
  0x3d   :  { %821 = vmatprep.subr.bf16.mxu1 %v1701_v0  ;;  %v1794_v0 = vld [vmem:[%s2439_s5 + $0x14] ss:$8 sps:$4 sm:$0xff]  }
  0x3f   :  { %847 = vmatpush1.bf16.msra.mxu0 %v1703_v3  ;;  %v1797_v3 = vld [vmem:[%s2439_s5 + $0x24] ss:$8 sps:$4 sm:$0xff]  }
  0x40   :  { %822 = vmatpush1.bf16.msra.mxu1 %v1706_v4  ;;  %848 = vmatprep.subr.bf16.mxu0 %v1712_v5  ;;  %v1795_v4 = vld [vmem:[%s2439_s5 + $0x20] ss:$8 sps:$4 sm:$0xff]   ;;  %v1800_v5 = vld [vmem:[%s2439_s5 + $0x34] ss:$8 sps:$4 sm:$0xff]  }
  0x41   :  { %873 = vmatprep.subr.bf16.mxu1 %v1715_v6  ;;  %v1798_v6 = vld [vmem:[%s2439_s5 + $0x30] ss:$8 sps:$4 sm:$0xff]  }
  0x43   :  { %824 = vmatmul.mubr.bf16.vlgmr.msra.gmra.mrb[0].mxu1 %v1432_v7  ;;  %849 = vmatpush1.bf16.msra.mxu0 %v1710_v8  ;;  %v1803_v7 = vld [vmem:[%s2439_s5 + $0x44] ss:$8 sps:$4 sm:$0xff]   ;;  %v1801_v8 = vld [vmem:[%s2439_s5 + $0x40] ss:$8 sps:$4 sm:$0xff]  }
  0x44   :  { %874 = vmatpush1.bf16.msra.mxu1 %v1713_v9  ;;  %850 = vmatprep.subr.bf16.mxu0 %v1718_v10  ;;  %v1806_v9 = vld [vmem:[%s2439_s5 + $0x54] ss:$8 sps:$4 sm:$0xff]   ;;  %v1804_v10 = vld [vmem:[%s2439_s5 + $0x50] ss:$8 sps:$4 sm:$0xff]  }
  0x45   :  { %875 = vmatprep.subr.bf16.mxu1 %v1721_v11  ;;  %905 = vmatprep.mubr.bf16.mxu1 %v1437_v27  ;;  %v1809_v11 = vld [vmem:[%s2439_s5 + $0x64] ss:$8 sps:$4 sm:$0xff]  }
  0x46   :  { %v1833_v27 = vld [vmem:[%s2439_s5 + $0xe4] ss:$8 sps:$4 sm:$0xff]  }
  0x47   :  { %851 = vmatpush1.bf16.msra.mxu0 %v1716_v14  ;;  %v1810_v14 = vld [vmem:[%s2439_s5 + $0x70] ss:$8 sps:$4 sm:$0xff]  }
  0x48   :  { %876 = vmatpush1.bf16.msra.mxu1 %v1719_v15  ;;  %852 = vmatprep.subr.bf16.mxu0 %v1724_v16  ;;  %v1815_v15 = vld [vmem:[%s2439_s5 + $0x84] ss:$8 sps:$4 sm:$0xff]   ;;  %v1813_v16 = vld [vmem:[%s2439_s5 + $0x80] ss:$8 sps:$4 sm:$0xff]  }
  0x49   :  { %877 = vmatprep.subr.bf16.mxu1 %v1727_v17  ;;  %v1818_v17 = vld [vmem:[%s2439_s5 + $0x94] ss:$8 sps:$4 sm:$0xff]  }
  0x4b   :  { %853 = vmatpush1.bf16.msra.mxu0 %v1722_v18  ;;  %v1816_v18 = vld [vmem:[%s2439_s5 + $0x90] ss:$8 sps:$4 sm:$0xff]  }
  0x4c   :  { %878 = vmatpush1.bf16.msra.mxu1 %v1725_v19  ;;  %854 = vmatprep.subr.bf16.mxu0 %v1730_v20  ;;  %v1821_v19 = vld [vmem:[%s2439_s5 + $0xa4] ss:$8 sps:$4 sm:$0xff]   ;;  %v1819_v20 = vld [vmem:[%s2439_s5 + $0xa0] ss:$8 sps:$4 sm:$0xff]  }
  0x4d   :  { %879 = vmatprep.subr.bf16.mxu1 %v1733_v21  ;;  %v1824_v21 = vld [vmem:[%s2439_s5 + $0xb4] ss:$8 sps:$4 sm:$0xff]  }
  0x4f   :  { %855 = vmatpush1.bf16.msra.mxu0 %v1728_v22  ;;  %v1822_v22 = vld [vmem:[%s2439_s5 + $0xb0] ss:$8 sps:$4 sm:$0xff]  }
  0x50   :  { %880 = vmatpush1.bf16.msra.mxu1 %v1731_v23  ;;  %856 = vmatprep.subr.bf16.mxu0 %v1736_v24  ;;  %v1827_v23 = vld [vmem:[%s2439_s5 + $0xc4] ss:$8 sps:$4 sm:$0xff]   ;;  %v1825_v24 = vld [vmem:[%s2439_s5 + $0xc0] ss:$8 sps:$4 sm:$0xff]  }
  0x51   :  { %881 = vmatprep.subr.bf16.mxu1 %v1739_v25  ;;  %v1830_v25 = vld [vmem:[%s2439_s5 + $0xd4] ss:$8 sps:$4 sm:$0xff]  }
  0x53   :  { %857 = vmatpush1.bf16.msra.mxu0 %v1734_v28  ;;  %v1831_v28 = vld [vmem:[%s2439_s5 + $0xe0] ss:$8 sps:$4 sm:$0xff]  }
  0x54   :  { %882 = vmatpush1.bf16.msra.mxu1 %v1737_v29  ;;  %858 = vmatprep.subr.bf16.mxu0 %v1742_v30  ;;  %v1834_v29 = vld [vmem:[%s2439_s5 + $0xf0] ss:$8 sps:$4 sm:$0xff]   ;;  %v1836_v30 = vld [vmem:[%s2439_s5 + $0xf4] ss:$8 sps:$4 sm:$0xff]  }
  0x55   :  { %883 = vmatprep.subr.bf16.mxu1 %v1745_v31  ;;  %v1837_v31 = vld [vmem:[%s2440_s7 + $0x40] sm:$0xff]  }
  0x57   :  { %859 = vmatpush1.bf16.msra.mxu0 %v1740_v32  ;;  %v1838_v32 = vld [vmem:[%s2440_s7] sm:$0xff]  }
  0x58   :  { %884 = vmatpush1.bf16.msra.mxu1 %v1743_v33  ;;  %860 = vmatprep.subr.bf16.mxu0 %v1748_v34  ;;  %v1839_v33 = vld [vmem:[%s2440_s7 + $0x48] sm:$0xff]  }
  0x59   :  { %885 = vmatprep.subr.bf16.mxu1 %v1751_v35  ;;  %v1840_v34 = vld [vmem:[%s2440_s7 + $0x8] sm:$0xff]   ;;  %v1841_v35 = vld [vmem:[%s2440_s7 + $0x50] sm:$0xff]  }
  0x5b   :  { %861 = vmatpush1.bf16.msra.mxu0 %v1746_v36  ;;  %v1842_v36 = vld [vmem:[%s2440_s7 + $0x10] sm:$0xff]  }
  0x5c   :  { %886 = vmatpush1.bf16.msra.mxu1 %v1749_v37  ;;  %862 = vmatprep.subr.bf16.mxu0 %v1754_v38  ;;  %v1843_v37 = vld [vmem:[%s2440_s7 + $0x58] sm:$0xff]  }
  0x5d   :  { %887 = vmatprep.subr.bf16.mxu1 %v1757_v39  ;;  %v1844_v38 = vld [vmem:[%s2440_s7 + $0x18] sm:$0xff]   ;;  %v1845_v39 = vld [vmem:[%s2440_s7 + $0x60] sm:$0xff]  }
  0x5f   :  { %863 = vmatpush1.bf16.msra.mxu0 %v1752_v40  ;;  %v1846_v40 = vld [vmem:[%s2440_s7 + $0x20] sm:$0xff]  }
  0x60   :  { %888 = vmatpush1.bf16.msra.mxu1 %v1755_v41  ;;  %914 = vmatprep.subr.bf16.mxu0 %v1783_v43  ;;  %v1847_v41 = vld [vmem:[%s2440_s7 + $0x68] sm:$0xff]  }
  0x61   :  { %889 = vmatprep.subr.bf16.mxu1 %v1762_v42 }
  0x62   :  { %865 = vmatmul.mubr.bf16.vlgmr.msra.gmra.mrb[4].mxu0 %v1434_v44 }
  0x63   :  { %915 = vmatpush1.bf16.msra.mxu0 %v1781_v46  ;;  %946 = vmatprep.mubr.bf16.mxu0 %v1857_v1  ;;  %v1769_v1 = vld [vmem:[%s2436_s2 + $0x2b0] ss:$8 sps:$4 sm:$0xff]  }
  0x64   :  { %890 = vmatpush1.bf16.msra.mxu1 %v1760_v45  ;;  %1181 = vmatprep.subr.bf16.mxu0 %v1791_v63  ;;  %v1848_v45 = vld [vmem:[%s2440_s7 + $0x28] sm:$0xff]  }
  0x65   :  { %891 = vmatprep.subr.bf16.mxu1 %v1765_v47 }
  0x68   :  { %892 = vmatpush1.bf16.msra.mxu1 %v1763_v48 }
  0x69   :  { %893 = vmatprep.subr.bf16.mxu1 %v1768_v49 }
  0x6a   :  { %1537 = vmatmul.mubr.msk.bf16.vlgmr.msra.gmra.mrb[8].mxu0 %vm787_vm0, %v1709_v50 }
  0x6b   :  { %1182 = vmatpush1.bf16.msra.mxu0 %v1789_v62  ;;  %v957_v62 = vlaneseq }
  0x6c   :  { %894 = vmatpush1.bf16.msra.mxu1 %v1766_v51  ;;  %1183 = vmatprep.subr.bf16.mxu0 %v1794_v0 }
  0x6d   :  { %895 = vmatprep.subr.bf16.mxu1 %v1771_v52  ;;  %v958_v63 = vshrl.u32 %v957_v62, 7 }
  0x6f   :  { %1184 = vmatpush1.bf16.msra.mxu0 %v1792_v2  ;;  %v959_v0 = vsub.s32 0, %v958_v63  ;;  %v955_v2 = vld [vmem:[%s2441_s4] sm:$0x3] }
  0x70   :  { %896 = vmatpush1.bf16.msra.mxu1 %v1769_v1  ;;  %1185 = vmatprep.subr.bf16.mxu0 %v1797_v3  ;;  %v963_v3 = vsub.s32 1, %v958_v63 }
  0x71   :  { %897 = vmatprep.subr.bf16.mxu1 %v1774_v53 }
  0x73   :  { %1186 = vmatpush1.bf16.msra.mxu0 %v1795_v4 }
  0x74   :  { %898 = vmatpush1.bf16.msra.mxu1 %v1772_v54  ;;  %1187 = vmatprep.subr.bf16.mxu0 %v1800_v5 }
  0x75   :  { %899 = vmatprep.subr.bf16.mxu1 %v1777_v55 }
  0x77   :  { %1188 = vmatpush1.bf16.msra.mxu0 %v1798_v6  ;;  %v960_v6 = vrot.slane %v955_v2, %v959_v0 }
  0x78   :  { %900 = vmatpush1.bf16.msra.mxu1 %v1775_v56  ;;  %1189 = vmatprep.subr.bf16.mxu0 %v1803_v7 }
  0x79   :  { %901 = vmatprep.subr.bf16.mxu1 %v1780_v57 }
  0x7b   :  { %1190 = vmatpush1.bf16.msra.mxu0 %v1801_v8 }
  0x7c   :  { %902 = vmatpush1.bf16.msra.mxu1 %v1778_v58  ;;  %1191 = vmatprep.subr.bf16.mxu0 %v1806_v9  ;;  %v964_v9 = vrot.slane %v955_v2, %v963_v3 }
  0x7d   :  { %903 = vmatprep.subr.bf16.mxu1 %v1786_v59 }
  0x7f   :  { %1192 = vmatpush1.bf16.msra.mxu0 %v1804_v10 }
  0x80   :  { %904 = vmatpush1.bf16.msra.mxu1 %v1784_v60  ;;  %1193 = vmatprep.subr.bf16.mxu0 %v1809_v11 }
  0x81   :  { %1588 = vmatprep.subr.bf16.mxu1 %v1837_v31 }
  0x83   :  { %906 = vmatmul.mubr.bf16.vlgmr.msra.gmra.mrb[4].mxu1 %v1436_v61  ;;  %1194 = vmatpush1.bf16.msra.mxu0 %v1807_v12 }
  0x84   :  { %1195 = vmatprep.subr.bf16.mxu0 %v1812_v13  ;;  %1589 = vmatpush3.bf16.msra.mxu1 %v1838_v32 }
  0x85   :  { %1590 = vmatprep.subr.bf16.mxu1 %v1839_v33 }
  0x87   :  { %1196 = vmatpush1.bf16.msra.mxu0 %v1810_v14 }
  0x88   :  { %1197 = vmatprep.subr.bf16.mxu0 %v1815_v15  ;;  %1591 = vmatpush3.bf16.msra.mxu1 %v1840_v34 }
  0x89   :  { %1592 = vmatprep.subr.bf16.mxu1 %v1841_v35 }
  0x8b   :  { %1198 = vmatpush1.bf16.msra.mxu0 %v1813_v16 }
  0x8c   :  { %1199 = vmatprep.subr.bf16.mxu0 %v1818_v17  ;;  %1593 = vmatpush3.bf16.msra.mxu1 %v1842_v36 }
  0x8d   :  { %1594 = vmatprep.subr.bf16.mxu1 %v1843_v37 }
  0x8f   :  { %1200 = vmatpush1.bf16.msra.mxu0 %v1816_v18 }
  0x90   :  { %1201 = vmatprep.subr.bf16.mxu0 %v1821_v19  ;;  %1595 = vmatpush3.bf16.msra.mxu1 %v1844_v38 }
  0x91   :  { %1596 = vmatprep.subr.bf16.mxu1 %v1845_v39 }
  0x93   :  { %1202 = vmatpush1.bf16.msra.mxu0 %v1819_v20 }
  0x94   :  { %1203 = vmatprep.subr.bf16.mxu0 %v1824_v21  ;;  %1597 = vmatpush3.bf16.msra.mxu1 %v1846_v40 }
  0x95   :  { %1598 = vmatprep.subr.bf16.mxu1 %v1847_v41 }
  0x97   :  { %1204 = vmatpush1.bf16.msra.mxu0 %v1822_v22  ;;  %v1849_v22 = vld [vmem:[%s2440_s7 + $0x70] sm:$0xff]  }
  0x98   :  { %1205 = vmatprep.subr.bf16.mxu0 %v1827_v23  ;;  %1599 = vmatpush3.bf16.msra.mxu1 %v1848_v45  ;;  %v1850_v23 = vld [vmem:[%s2440_s7 + $0x30] sm:$0xff]  }
  0x99   :  { %1600 = vmatprep.subr.bf16.mxu1 %v1849_v22 }
  0x9b   :  { %1206 = vmatpush1.bf16.msra.mxu0 %v1825_v24  ;;  %v1851_v24 = vld [vmem:[%s2440_s7 + $0x78] sm:$0xff]  }
  0x9c   :  { %1207 = vmatprep.subr.bf16.mxu0 %v1830_v25  ;;  %1601 = vmatpush3.bf16.msra.mxu1 %v1850_v23  ;;  %v1852_v25 = vld [vmem:[%s2440_s7 + $0x38] sm:$0xff]  }
  0x9d   :  { %1602 = vmatprep.subr.bf16.mxu1 %v1851_v24 }
  0x9f   :  { %1208 = vmatpush1.bf16.msra.mxu0 %v1828_v26  ;;  %v1009_v26 = vld [vmem:[%s2442_s6] sm:$0x3] }
  0xa0   :  { %1209 = vmatprep.subr.bf16.mxu0 %v1833_v27  ;;  %1603 = vmatpush3.bf16.msra.mxu1 %v1852_v25  ;;  %v1014_v27 = vrot.slane %v1009_v26, %v959_v0 }
  0xa3   :  { %1210 = vmatpush1.bf16.msra.mxu0 %v1831_v28  ;;  %v1018_v28 = vrot.slane %v1009_v26, %v963_v3 }
  0xa4   :  { %1211 = vmatprep.subr.bf16.mxu0 %v1836_v30 }
  0xa7   :  { %1212 = vmatpush1.bf16.msra.mxu0 %v1834_v29 }
  0xf5   :  { %v266_v42 = vpop.f32.mrb[0].mxu0 }
  0xf6   :  { %v268_v43 = vpop.f32.mrb[1].mxu0 }
  0xf7   :  { %v270_v44 = vpop.f32.mrb[2].mxu0 }
  0xf8   :  { %v271_v46 = vpop.f32.mrb[3].mxu0 }
 0x116   :  { %v825_v47 = vpop.f32.mrb[0].mxu1 }
 0x117   :  { %v826_v48 = vadd.f32 %v825_v47, %v266_v42  ;;  %v827_v49 = vpop.f32.mrb[1].mxu1  ;;  %v1570_v42 = vld [vmem:[%s2443_s8] ss:$0 sm:$0xff] }
 0x118   :  { %v828_v50 = vadd.f32 %v827_v49, %v268_v43  ;;  %v829_v51 = vpop.f32.mrb[2].mxu1 }
 0x119   :  { %v830_v52 = vpop.f32.mrb[3].mxu1 }
 0x135   :  { %v866_v1 = vpop.f32.mrb[4].mxu0 }
 0x136   :  { %v867_v53 = vadd.f32 %v866_v1, %v826_v48  ;;  %v868_v54 = vpop.f32.mrb[5].mxu0 }
 0x137   :  { %v869_v55 = vadd.f32 %v868_v54, %v828_v50  ;;  %v870_v56 = vpop.f32.mrb[6].mxu0 }
 0x138   :  { %v871_v57 = vpop.f32.mrb[7].mxu0 }
 0x13d   :  { %v948_v58 = vpop.f32.mrb[8].mxu0 }
 0x13e   :  { %v950_v59 = vpop.f32.mrb[9].mxu0 }
 0x13f   :  { %v952_v60 = vpop.f32.mrb[10].mxu0 }
 0x140   :  { %v953_v61 = vpop.f32.mrb[11].mxu0 }
 0x156   :  { %v907_v4 = vpop.f32.mrb[4].mxu1 }
 0x157   :  { %v908_v5 = vadd.f32 %v907_v4, %v867_v53  ;;  %v909_v7 = vpop.f32.mrb[5].mxu1 }
 0x158   :  { %v910_v8 = vadd.f32 %v909_v7, %v869_v55  ;;  %v911_v10 = vpop.f32.mrb[6].mxu1 }
 0x159   :  { %v949_v11 = vadd.f32 %v948_v58, %v908_v5  ;;  %v912_v12 = vpop.f32.mrb[7].mxu1 }
 0x15a   :  { %v951_v13 = vadd.f32 %v950_v59, %v910_v8 }
 0x15b   :  { %v967_v14 = vadd.f32 %v960_v6, %v949_v11 }
 0x15c   :  { %v968_v15 = vadd.f32 %v964_v9, %v951_v13 }
 0x15d   :  { %vm969_vm1 = vcmp.gt.f32.partialorder %v967_v14, 0.0  ;;  %v971_v16 = vmul.f32 0.2, %v967_v14 }
 0x15e   :  { %vm970_vm2 = vcmp.gt.f32.partialorder %v968_v15, 0.0  ;;  %v972_v17 = vmul.f32 0.2, %v968_v15 }
 0x15f   :  { %v973_v18 = vsel %vm969_vm1, %v967_v14, %v971_v16 }
 0x160   :  { %v974_v19 = vsel %vm970_vm2, %v968_v15, %v972_v17  ;;  %v975_v21 = vpack.c.bf16 %v973_v18, %v973_v18 }
 0x161   :  { %v976_v20 = vpack.c.bf16 %v974_v19, %v974_v19 }
 0x163   :  { %1213 = vmatprep.mubr.bf16.mxu0 %v976_v20 }
 0x164   :  { %1214 = vmatmul.mubr.bf16.vlgmr.msra.gmra.mrb[12].mxu0 %v975_v21 }
 0x237   :  { %v1215_v29 = vpop.f32.mrb[12].mxu0 }
 0x238   :  { %v1216_v30 = vadd.f32 %v1215_v29, %v1014_v27  ;;  %v1217_v31 = vpop.f32.mrb[13].mxu0 }
 0x239   :  { %v1218_v32 = vadd.f32 %v1217_v31, %v1018_v28  ;;  %v1219_v33 = vpop.f32.mrb[14].mxu0 }
 0x23a   :  { %vm1222_vm3 = vcmp.gt.f32.partialorder %v1216_v30, 0.0  ;;  %v1224_v34 = vmul.f32 0.2, %v1216_v30  ;;  %v1220_v35 = vpop.f32.mrb[15].mxu0 }
 0x23b   :  { %vm1223_vm4 = vcmp.gt.f32.partialorder %v1218_v32, 0.0  ;;  %v1225_v36 = vmul.f32 0.2, %v1218_v32 }
 0x23c   :  { %v1226_v37 = vsel %vm1222_vm3, %v1216_v30, %v1224_v34 }
 0x23d   :  { %v1227_v38 = vsel %vm1223_vm4, %v1218_v32, %v1225_v36  ;;  %v1228_v40 = vpack.c.bf16 %v1226_v37, %v1226_v37 }
 0x23e   :  { %v1229_v39 = vpack.c.bf16 %v1227_v38, %v1227_v38 }
 0x240   :  { %1397 = vmatprep.mubr.bf16.mxu1 %v1229_v39 }
 0x241   :  { %1398 = vmatmul.mubr.bf16.vlgmr.msra.gmra.mrb[8].mxu1 %v1228_v40 }
 0x314   :  { %v1604_v41 = vpop.f32.mrb[8].mxu1 }
 0x315   :  { %v1605_v43 = vpop.f32.mrb[9].mxu1 }
 0x316   :  { %v1606_v44 = vadd.f32 %v1605_v43, %v1604_v41  ;;  %v1607_v45 = vpop.f32.mrb[10].mxu1 }
 0x317   :  { %v1608_v46 = vpop.f32.mrb[11].mxu1 }
 0x318   :  { %v1400_v47 = vadd.f32 %v1606_v44, %v1570_v42 }
 0x31a   :  { %v1587_v48 = vmul.f32 -1.442695, %v1400_v47 }
 0x31c   :  { %1853 = vpow2.f32 %v1587_v48 }
 0x326   :  { %v1854_v49 = vpop.eup %1853 }
 0x327   :  { %v1408_v50 = vadd.f32 1.0, %v1854_v49 }
 0x329   :  { %1855 = vrcp.f32 %v1408_v50 }
 0x333   :  { %v1856_v51 = vpop.eup %1855 }
 0x334   :  { %1411 = vst [vmem:[%s2444_s9] sm:$0xff] %v1856_v51 }

</bundles_post_ra>
